<compile_context>
chip_gen: v6e
topology: v6e:2x2x1
jax: 0.10.0
libtpu: 0.0.40
codegen_flags: <defaults>
</compile_context>

<pallas_src>
import math

import jax
import jax.numpy as jnp
from jax.experimental import pallas as pl
from jax.experimental.pallas import tpu as pltpu


_ROW_GROUP = 8      # f32 sublane count
_LANE = 128


def _round_up(n: int, m: int) -> int:
    return ((n + m - 1) // m) * m


def _cdiv(a: int, b: int) -> int:
    return -(-a // b)


def _pe_add_kernel(idx_ref, x_ref, pe_ref, o_ref):
    # idx_ref: (rows_padded,) int32, SMEM (scalar-prefetched, pre-clipped)
    # x_ref  : (TM, DK)  VMEM
    # pe_ref : (L, DK)   VMEM (resident; constant along the inner row axis)
    # o_ref  : (TM, DK)  VMEM
    tm = x_ref.shape[0]
    base = pl.program_id(1) * tm

    def row_body(r, carry):
        i = idx_ref[base + r]
        x_row = x_ref[pl.ds(r, 1), :].astype(o_ref.dtype)
        pe_row = pe_ref[pl.ds(i, 1), :].astype(o_ref.dtype)
        o_ref[pl.ds(r, 1), :] = x_row + pe_row
        return carry

    jax.lax.fori_loop(0, tm, row_body, 0, unroll=8)


def fixed_positional_encoding(x, tss_indexes, pe, *, block_rows=None,
                              block_cols=None):
    """out = x + pe[tss_indexes]; dropout is identity (eval mode).

    x: [B, S, D] float; tss_indexes: [B, S] integer; pe: [L, D] float32.
    """
    B, S, D = x.shape
    L, d_pe = pe.shape
    assert d_pe == D

    # Match `x + pe[idx]` dtype promotion (e.g. bf16 x + f32 pe -> f32 out).
    out_dtype = jnp.promote_types(x.dtype, pe.dtype)
    total_rows = B * S

    # ---- generation-aware VMEM budget -------------------------------------
    try:
        vmem_cap = int(pltpu.get_tpu_info().vmem_capacity_bytes)
    except Exception:
        vmem_cap = 64 * 1024 * 1024
    # v6e/v5e (128 MiB) -> 96 MiB limit; v7x (64 MiB) -> 48 MiB limit.
    vmem_limit = max(16 * 1024 * 1024,
                     min((vmem_cap * 3) // 4, 96 * 1024 * 1024))
    budget = vmem_limit - 2 * 1024 * 1024

    pe_item = jnp.dtype(pe.dtype).itemsize
    x_item = jnp.dtype(x.dtype).itemsize
    o_item = jnp.dtype(out_dtype).itemsize

    def pe_footprint(dk):        # pipeline keeps 2 buffers for the pe block
        return 2 * _round_up(L, _ROW_GROUP) * _round_up(dk, _LANE) * pe_item

    # ---- feature-dim (lane) tiling: full D unless the pe table won't fit ---
    if block_cols is not None:
        assert block_cols == D or block_cols % _LANE == 0
        dk = block_cols
    else:
        dk = D
        if pe_footprint(dk) > budget // 2 and D > _LANE:
            dk = _LANE
            while dk + _LANE < D and pe_footprint(dk + _LANE) <= budget // 2:
                dk += _LANE
    num_d_tiles = _cdiv(D, dk)

    # ---- row tiling: as large as the remaining budget allows ---------------
    per_row = 2 * _round_up(dk, _LANE) * (x_item + o_item)   # dbl-buffered x+o
    if block_rows is not None:
        tm = _round_up(block_rows, _ROW_GROUP)
    else:
        row_budget = max(budget - pe_footprint(dk), per_row * _ROW_GROUP)
        tm = (row_budget // per_row) // _ROW_GROUP * _ROW_GROUP
        tm = max(_ROW_GROUP,
                 min(tm, 4096, _round_up(total_rows, _ROW_GROUP)))
        if total_rows > _ROW_GROUP:
            # keep >= 2 row tiles so both v7x TensorCores get work
            tm = min(tm, _round_up(_cdiv(total_rows, 2), _ROW_GROUP))
    num_row_tiles = _cdiv(total_rows, tm)
    rows_padded = num_row_tiles * tm

    # Clip once in the wrapper (off the per-row scalar critical path); pad the
    # (tiny) index vector so every SMEM read in the ragged last tile is valid.
    idx = jnp.clip(tss_indexes.reshape(total_rows).astype(jnp.int32), 0, L - 1)
    idx = jnp.pad(idx, (0, rows_padded - total_rows))

    xf = x.reshape(total_rows, D)

    out_flat = pl.pallas_call(
        _pe_add_kernel,
        out_shape=jax.ShapeDtypeStruct((total_rows, D), out_dtype),
        grid_spec=pltpu.PrefetchScalarGridSpec(
            num_scalar_prefetch=1,            # idx -> SMEM
            grid=(num_d_tiles, num_row_tiles),
            in_specs=[
                pl.BlockSpec((tm, dk), lambda j, t, idx_ref: (t, j)),   # x
                pl.BlockSpec((L, dk), lambda j, t, idx_ref: (0, j)),    # pe
            ],
            out_specs=pl.BlockSpec((tm, dk), lambda j, t, idx_ref: (t, j)),
        ),
        compiler_params=pltpu.CompilerParams(
            dimension_semantics=("parallel", "parallel"),
            vmem_limit_bytes=vmem_limit,
        ),
    )(idx, xf, pe)

    return out_flat.reshape(B, S, D)


def make_pe_table(dim: int, max_len: int) -> jnp.ndarray:
    """Deterministic buffer init, identical to the PyTorch __init__."""
    position = jnp.arange(max_len, dtype=jnp.float32)[:, None]
    div_term = jnp.exp(
        jnp.arange(0, dim, 2, dtype=jnp.float32) * (-math.log(10000.0) / dim))
    pe = jnp.zeros((max_len, dim), dtype=jnp.float32)
    pe = pe.at[:, 0::2].set(jnp.sin(position * div_term))
    pe = pe.at[:, 1::2].set(jnp.cos(position * div_term))
    return pe


if __name__ == "__main__":
    def ref_fn(x, idx, pe):
        # Pure-JAX reference of the PyTorch forward (dropout = identity).
        return x + pe[idx]

    key = jax.random.PRNGKey(0)
    kx, ki, key = jax.random.split(key, 3)

    # Case 1: module-like small shapes (batch=2, seq=8, dim=32).
    B, S, D, MAX_LEN = 2, 8, 32, 128
    x = jax.random.normal(kx, (B, S, D), dtype=jnp.float32)
    tss = jax.random.randint(ki, (B, S), minval=0, maxval=MAX_LEN, dtype=jnp.int32)
    pe = make_pe_table(D, MAX_LEN)

    out = jax.block_until_ready(fixed_positional_encoding(x, tss, pe))
    ref = ref_fn(x, tss, pe)
    assert out.shape == ref.shape and out.dtype == ref.dtype
    assert jnp.allclose(out, ref, atol=1e-5, rtol=1e-5), "mismatch vs reference"

    # Explicit multi-row-tile grid (2 row tiles of 8 rows each).
    out2 = jax.block_until_ready(
        fixed_positional_encoding(x, tss, pe, block_rows=8))
    assert jnp.allclose(out2, ref, atol=1e-5, rtol=1e-5), "mismatch (tiled rows)"

    # Case 2: ragged row tile + feature dim not a multiple of 128 (full-D block).
    kx2, ki2, key = jax.random.split(key, 3)
    B2, S2, D2, L2 = 3, 5, 48, 64
    x2 = jax.random.normal(kx2, (B2, S2, D2), dtype=jnp.float32)
    tss2 = jax.random.randint(ki2, (B2, S2), minval=0, maxval=L2, dtype=jnp.int32)
    pe2 = make_pe_table(D2, L2)
    out3 = jax.block_until_ready(fixed_positional_encoding(x2, tss2, pe2))
    ref3 = ref_fn(x2, tss2, pe2)
    assert out3.shape == ref3.shape and out3.dtype == ref3.dtype
    assert jnp.allclose(out3, ref3, atol=1e-5, rtol=1e-5), "mismatch (ragged)"

    # Case 3: forced feature-dim tiling (the large-pe guard path) + ragged rows.
    kx3, ki3, key = jax.random.split(key, 3)
    B3, S3, D3, L3 = 2, 6, 256, 32
    x3 = jax.random.normal(kx3, (B3, S3, D3), dtype=jnp.float32)
    tss3 = jax.random.randint(ki3, (B3, S3), minval=0, maxval=L3, dtype=jnp.int32)
    pe3 = make_pe_table(D3, L3)
    out4 = jax.block_until_ready(
        fixed_positional_encoding(x3, tss3, pe3, block_cols=128))
    ref4 = ref_fn(x3, tss3, pe3)
    assert jnp.allclose(out4, ref4, atol=1e-5, rtol=1e-5), "mismatch (d-tiled)"

    # Case 4: bf16 activations + f32 pe -> f32 out (dtype promotion path).
    kx4, ki4 = jax.random.split(key)
    x4 = jax.random.normal(kx4, (B, S, D), dtype=jnp.bfloat16)
    tss4 = jax.random.randint(ki4, (B, S), minval=0, maxval=MAX_LEN,
                              dtype=jnp.int32)
    out5 = jax.block_until_ready(fixed_positional_encoding(x4, tss4, pe))
    ref5 = ref_fn(x4, tss4, pe)
    assert out5.dtype == ref5.dtype
    assert jnp.allclose(out5, ref5, atol=1e-4, rtol=1e-4), "mismatch (bf16)"

    print("KERNEL_OK")
</pallas_src>

<mosaic_0001>
module attributes {stable_mosaic.version = 11 : i64} {
  func.func @_pe_add_kernel(%arg0: i32, %arg1: i32, %arg2: memref<16xi32, #tpu.memory_space<smem>>, %arg3: memref<8x32xf32, #tpu.memory_space<vmem>>, %arg4: memref<128x32xf32, #tpu.memory_space<vmem>>, %arg5: memref<8x32xf32, #tpu.memory_space<vmem>>) attributes {dimension_semantics = [#tpu.dimension_semantics<parallel>, #tpu.dimension_semantics<parallel>], iteration_bounds = array<i64: 1, 2>, scalar_prefetch = 1 : i64, scratch_operands = 0 : i64, tpu.core_type = #tpu.core_type<tc>, window_params = [{transform_indices = @transform_0, window_bounds = array<i64: 8, 32>}, {transform_indices = @transform_1, window_bounds = array<i64: 128, 32>}, {transform_indices = @transform_2, window_bounds = array<i64: 8, 32>}]} {
    %c8_i32 = arith.constant 8 : i32
    %0 = arith.muli %arg1, %c8_i32 : i32
    %c0_i32 = arith.constant 0 : i32
    %1 = arith.addi %0, %c0_i32 : i32
    %2 = arith.index_cast %1 : i32 to index
    %3 = memref.load %arg2[%2] : memref<16xi32, #tpu.memory_space<smem>>
    %4 = arith.index_cast %c0_i32 : i32 to index
    %c0 = arith.constant 0 : index
    %5 = vector.load %arg3[%4, %c0] : memref<8x32xf32, #tpu.memory_space<vmem>>, vector<1x32xf32>
    %6 = arith.index_cast %3 : i32 to index
    %c0_0 = arith.constant 0 : index
    %7 = vector.load %arg4[%6, %c0_0] : memref<128x32xf32, #tpu.memory_space<vmem>>, vector<1x32xf32>
    %8 = arith.addf %5, %7 : vector<1x32xf32>
    %9 = arith.index_cast %c0_i32 : i32 to index
    %c0_1 = arith.constant 0 : index
    %10 = vector.load %arg5[%9, %c0_1] : memref<8x32xf32, #tpu.memory_space<vmem>>, vector<1x32xf32>
    tpu.vector_store %arg5[%9, %c0_1], %8 {strides = array<i32>} : memref<8x32xf32, #tpu.memory_space<vmem>>, vector<1x32xf32>,
    %c1_i32 = arith.constant 1 : i32
    %11 = arith.addi %0, %c1_i32 : i32
    %12 = arith.index_cast %11 : i32 to index
    %13 = memref.load %arg2[%12] : memref<16xi32, #tpu.memory_space<smem>>
    %14 = arith.index_cast %c1_i32 : i32 to index
    %c0_2 = arith.constant 0 : index
    %15 = vector.load %arg3[%14, %c0_2] : memref<8x32xf32, #tpu.memory_space<vmem>>, vector<1x32xf32>
    %16 = arith.index_cast %13 : i32 to index
    %c0_3 = arith.constant 0 : index
    %17 = vector.load %arg4[%16, %c0_3] : memref<128x32xf32, #tpu.memory_space<vmem>>, vector<1x32xf32>
    %18 = arith.addf %15, %17 : vector<1x32xf32>
    %19 = arith.index_cast %c1_i32 : i32 to index
    %c0_4 = arith.constant 0 : index
    %20 = vector.load %arg5[%19, %c0_4] : memref<8x32xf32, #tpu.memory_space<vmem>>, vector<1x32xf32>
    tpu.vector_store %arg5[%19, %c0_4], %18 {strides = array<i32>} : memref<8x32xf32, #tpu.memory_space<vmem>>, vector<1x32xf32>,
    %c2_i32 = arith.constant 2 : i32
    %21 = arith.addi %0, %c2_i32 : i32
    %22 = arith.index_cast %21 : i32 to index
    %23 = memref.load %arg2[%22] : memref<16xi32, #tpu.memory_space<smem>>
    %24 = arith.index_cast %c2_i32 : i32 to index
    %c0_5 = arith.constant 0 : index
    %25 = vector.load %arg3[%24, %c0_5] : memref<8x32xf32, #tpu.memory_space<vmem>>, vector<1x32xf32>
    %26 = arith.index_cast %23 : i32 to index
    %c0_6 = arith.constant 0 : index
    %27 = vector.load %arg4[%26, %c0_6] : memref<128x32xf32, #tpu.memory_space<vmem>>, vector<1x32xf32>
    %28 = arith.addf %25, %27 : vector<1x32xf32>
    %29 = arith.index_cast %c2_i32 : i32 to index
    %c0_7 = arith.constant 0 : index
    %30 = vector.load %arg5[%29, %c0_7] : memref<8x32xf32, #tpu.memory_space<vmem>>, vector<1x32xf32>
    tpu.vector_store %arg5[%29, %c0_7], %28 {strides = array<i32>} : memref<8x32xf32, #tpu.memory_space<vmem>>, vector<1x32xf32>,
    %c3_i32 = arith.constant 3 : i32
    %31 = arith.addi %0, %c3_i32 : i32
    %32 = arith.index_cast %31 : i32 to index
    %33 = memref.load %arg2[%32] : memref<16xi32, #tpu.memory_space<smem>>
    %34 = arith.index_cast %c3_i32 : i32 to index
    %c0_8 = arith.constant 0 : index
    %35 = vector.load %arg3[%34, %c0_8] : memref<8x32xf32, #tpu.memory_space<vmem>>, vector<1x32xf32>
    %36 = arith.index_cast %33 : i32 to index
    %c0_9 = arith.constant 0 : index
    %37 = vector.load %arg4[%36, %c0_9] : memref<128x32xf32, #tpu.memory_space<vmem>>, vector<1x32xf32>
    %38 = arith.addf %35, %37 : vector<1x32xf32>
    %39 = arith.index_cast %c3_i32 : i32 to index
    %c0_10 = arith.constant 0 : index
    %40 = vector.load %arg5[%39, %c0_10] : memref<8x32xf32, #tpu.memory_space<vmem>>, vector<1x32xf32>
    tpu.vector_store %arg5[%39, %c0_10], %38 {strides = array<i32>} : memref<8x32xf32, #tpu.memory_space<vmem>>, vector<1x32xf32>,
    %c4_i32 = arith.constant 4 : i32
    %41 = arith.addi %0, %c4_i32 : i32
    %42 = arith.index_cast %41 : i32 to index
    %43 = memref.load %arg2[%42] : memref<16xi32, #tpu.memory_space<smem>>
    %44 = arith.index_cast %c4_i32 : i32 to index
    %c0_11 = arith.constant 0 : index
    %45 = vector.load %arg3[%44, %c0_11] : memref<8x32xf32, #tpu.memory_space<vmem>>, vector<1x32xf32>
    %46 = arith.index_cast %43 : i32 to index
    %c0_12 = arith.constant 0 : index
    %47 = vector.load %arg4[%46, %c0_12] : memref<128x32xf32, #tpu.memory_space<vmem>>, vector<1x32xf32>
    %48 = arith.addf %45, %47 : vector<1x32xf32>
    %49 = arith.index_cast %c4_i32 : i32 to index
    %c0_13 = arith.constant 0 : index
    %50 = vector.load %arg5[%49, %c0_13] : memref<8x32xf32, #tpu.memory_space<vmem>>, vector<1x32xf32>
    tpu.vector_store %arg5[%49, %c0_13], %48 {strides = array<i32>} : memref<8x32xf32, #tpu.memory_space<vmem>>, vector<1x32xf32>,
    %c5_i32 = arith.constant 5 : i32
    %51 = arith.addi %0, %c5_i32 : i32
    %52 = arith.index_cast %51 : i32 to index
    %53 = memref.load %arg2[%52] : memref<16xi32, #tpu.memory_space<smem>>
    %54 = arith.index_cast %c5_i32 : i32 to index
    %c0_14 = arith.constant 0 : index
    %55 = vector.load %arg3[%54, %c0_14] : memref<8x32xf32, #tpu.memory_space<vmem>>, vector<1x32xf32>
    %56 = arith.index_cast %53 : i32 to index
    %c0_15 = arith.constant 0 : index
    %57 = vector.load %arg4[%56, %c0_15] : memref<128x32xf32, #tpu.memory_space<vmem>>, vector<1x32xf32>
    %58 = arith.addf %55, %57 : vector<1x32xf32>
    %59 = arith.index_cast %c5_i32 : i32 to index
    %c0_16 = arith.constant 0 : index
    %60 = vector.load %arg5[%59, %c0_16] : memref<8x32xf32, #tpu.memory_space<vmem>>, vector<1x32xf32>
    tpu.vector_store %arg5[%59, %c0_16], %58 {strides = array<i32>} : memref<8x32xf32, #tpu.memory_space<vmem>>, vector<1x32xf32>,
    %c6_i32 = arith.constant 6 : i32
    %61 = arith.addi %0, %c6_i32 : i32
    %62 = arith.index_cast %61 : i32 to index
    %63 = memref.load %arg2[%62] : memref<16xi32, #tpu.memory_space<smem>>
    %64 = arith.index_cast %c6_i32 : i32 to index
    %c0_17 = arith.constant 0 : index
    %65 = vector.load %arg3[%64, %c0_17] : memref<8x32xf32, #tpu.memory_space<vmem>>, vector<1x32xf32>
    %66 = arith.index_cast %63 : i32 to index
    %c0_18 = arith.constant 0 : index
    %67 = vector.load %arg4[%66, %c0_18] : memref<128x32xf32, #tpu.memory_space<vmem>>, vector<1x32xf32>
    %68 = arith.addf %65, %67 : vector<1x32xf32>
    %69 = arith.index_cast %c6_i32 : i32 to index
    %c0_19 = arith.constant 0 : index
    %70 = vector.load %arg5[%69, %c0_19] : memref<8x32xf32, #tpu.memory_space<vmem>>, vector<1x32xf32>
    tpu.vector_store %arg5[%69, %c0_19], %68 {strides = array<i32>} : memref<8x32xf32, #tpu.memory_space<vmem>>, vector<1x32xf32>,
    %c7_i32 = arith.constant 7 : i32
    %71 = arith.addi %0, %c7_i32 : i32
    %72 = arith.index_cast %71 : i32 to index
    %73 = memref.load %arg2[%72] : memref<16xi32, #tpu.memory_space<smem>>
    %74 = arith.index_cast %c7_i32 : i32 to index
    %c0_20 = arith.constant 0 : index
    %75 = vector.load %arg3[%74, %c0_20] : memref<8x32xf32, #tpu.memory_space<vmem>>, vector<1x32xf32>
    %76 = arith.index_cast %73 : i32 to index
    %c0_21 = arith.constant 0 : index
    %77 = vector.load %arg4[%76, %c0_21] : memref<128x32xf32, #tpu.memory_space<vmem>>, vector<1x32xf32>
    %78 = arith.addf %75, %77 : vector<1x32xf32>
    %79 = arith.index_cast %c7_i32 : i32 to index
    %c0_22 = arith.constant 0 : index
    %80 = vector.load %arg5[%79, %c0_22] : memref<8x32xf32, #tpu.memory_space<vmem>>, vector<1x32xf32>
    tpu.vector_store %arg5[%79, %c0_22], %78 {strides = array<i32>} : memref<8x32xf32, #tpu.memory_space<vmem>>, vector<1x32xf32>,
    %c8_i32_23 = arith.constant 8 : i32
    return
  }
  func.func @transform_0(%arg0: i32, %arg1: i32, %arg2: memref<16xi32, #tpu.memory_space<smem>>) -> (i32, i32) {
    %c0_i32 = arith.constant 0 : i32
    return %arg1, %arg0 : i32, i32
  }
  func.func @transform_1(%arg0: i32, %arg1: i32, %arg2: memref<16xi32, #tpu.memory_space<smem>>) -> (i32, i32) {
    %c0_i32 = arith.constant 0 : i32
    %c0_i32_0 = arith.constant 0 : i32
    return %c0_i32, %arg0 : i32, i32
  }
  func.func @transform_2(%arg0: i32, %arg1: i32, %arg2: memref<16xi32, #tpu.memory_space<smem>>) -> (i32, i32) {
    %c0_i32 = arith.constant 0 : i32
    return %arg1, %arg0 : i32, i32
  }
}

</mosaic_0001>

<bundles_post_ra>
// kernel: tpu_custom_call.1
= control target key start
LH: loop header
LB: loop body
LE: loop exit
PB: predicated region body
PF: predicated region fallthrough
CT: control target
= control target key end

     0   :  { %s713_s0 = inlined_call_operand.vmem [shape: s32[16], index: 0, kind: input, shape index: {}]   ;;  %s714_s1 = inlined_call_operand.vmem [shape: f32[16,32], index: 1, kind: input, shape index: {}]   ;;  %s715_s2 = inlined_call_operand.vmem [shape: f32[128,32], index: 2, kind: input, shape index: {}]   ;;  %s716_s3 = inlined_call_operand.hbm [shape: f32[16,32], index: 3, kind: output, shape index: {}]  }
   0x1   :  { %718 = sst [smem:[#allocation8_spill]] %s714_s1  ;;  %s8_s14 = sshll.u32 %s713_s0, 4  ;;  %s9_s14 = int_to_ptr.vmem [resolvable:$true] %s8_s14 }
   0x2   :  { %s423_s15 = scalar_lea.vmem %s9_s14, 16  ;;  %p428_p1 = scmp.lt.s32.totalorder %s9_s14, %s9_s14 }
   0x3   :  { %p424_p0 = scmp.ne.s32.totalorder %s9_s14, %s423_s15  ;;  %p429_p2 = scmp.lt.s32.totalorder %s423_s15, %s423_s15 }
   0x5   :  { %p430_p3 = por %p429_p2, %p428_p1 }
   0x7   :  { %p431_p4 = pnand %p430_p3, %p424_p0 }
   0x9   :  { %434 = shalt.err (!%p431_p4)  }
   0xa   :  { %s515_s16 = smov [#allocation3]  }
   0xb   :  { %11 = dma.vmem_to_smem %s9_s14, 16, %s515_s16, [#allocation2] }
   0xc   :  { %485 = dma.done.wait [#allocation2], 16 }
   0xd   :  { %486 = vsyncadd [#allocation2], 4294967280 }
   0xe   :  { %13 = sfence }
   0xf   :  { %14 = vsyncpa [#allocation5], 0 }
  0x10   :  { %16 = vsyncpa [#allocation5 + $0x1], 0  ;;  %s540_s17 = smov 0   ;;  %s542_s18 = smov 0  }
  0x11   :  { %s544_s0 = smov 0   ;;  %s546_s19 = smov 0  }
  0x12   :  { %s548_s20 = smov 0   ;;  %s550_s21 = smov 0  }
  0x13 LB: > { %s354_s22 = sadd.s32 4294967295, %s513_s21   ;;  %s355_s23 = sadd.s32 4294967294, %s513_s21   ;;  %s513_s21 = sphi %s550_s21, %s22_s21   ;;  %s509_s20 = sphi %s548_s20, %s727_s20   ;;  %s505_s19 = sphi %s546_s19, %s726_s19   ;;  %s501_s0 = sphi %s544_s0, %s725_s0   ;;  %s497_s18 = sphi %s542_s18, %s724_s18   ;;  %s493_s17 = sphi %s540_s17, %s723_s17  }
  0x14   : > { %s31_s24 = sadd.s32 1, %s509_s20  ;;  %s97_s25 = sadd.s32 1, %s501_s0 }
  0x15   : > { %p32_p5 = scmp.ge.s32.totalorder %s31_s24, 2  ;;  %p107_p6 = scmp.ne.s32.totalorder %s501_s0, %s497_s18 }
  0x16   : > { %p108_p7 = scmp.eq.s32.totalorder %s354_s22, 1  ;;  %p113_p8 = scmp.ne.s32.totalorder %s497_s18, %s493_s17 }
  0x17   : > { %s729_s24 = smov (%p32_p5, %s31_s24), 0  ;;  %p114_p10 = scmp.eq.s32.totalorder %s355_s23, 1 }
  0x18   : > { %p580_p9 = por %p108_p7, %p107_p6  ;;  %s92_s27 = ssub.s32 %s509_s20, %s729_s24 }
  0x19   : > { %p359_p11 = scmp.ge.s32.totalorder %s513_s21, 1  ;;  %p95_p12 = scmp.eq.s32.totalorder %s92_s27, 0 }
  0x1a   : > { %p587_p13 = por %p114_p10, %p113_p8  ;;  %p149_p0 = scmp.lt.s32.totalorder %s513_s21, 3 }
  0x1b   : > { %s593_s29 = scalar_select %p95_p12, %s501_s0, %s97_s25  }
  0x1c   : > { %p150_p1 = pnand %p359_p11, %p149_p0 }
  0x1d   : > { %s717_s30 = sand.u32 (!%p150_p1), 1, %s497_s18   ;;  %p177_p2 = scmp.lt.s32.totalorder (!%p150_p1), %s505_s19, 1 }
  0x1e   : > { %153 = sbr.rel (%p150_p1) target bundleno = 71 (0x47), region = 28  ;;  %s360_s4 = sshll.u32 (!%p150_p1), %s717_s30, 3 }
  0x1f   : > { %s600_s5 = sshll.u32 (!%p150_p1), %s505_s19, 3  ;;  %s721_s1 = sld [smem:[#allocation8_spill]] (!%p150_p1) }
  0x20   : > { %s189_s6 = sld [smem:[#allocation3 + %s600_s5]] (!%p150_p1)  ;;  %s196_s8 = sadd.s32 (!%p150_p1), 1, %s600_s5 }
  0x21   : > { %s197_s10 = sld [smem:[#allocation3 + %s196_s8]] (!%p150_p1)  ;;  %s203_s14 = sadd.s32 (!%p150_p1), 2, %s600_s5 }
  0x22   : > { %s204_s15 = sld [smem:[#allocation3 + %s203_s14]] (!%p150_p1)  ;;  %s210_s16 = sadd.s32 (!%p150_p1), 3, %s600_s5 }
  0x23   : > { %s178_s7 = scalar_select %p177_p2, %s505_s19, 1  ;;  %vm194_vm0 = vcmask 253952  }
  0x24   : > { %s211_s27 = sld [smem:[#allocation3 + %s210_s16]]  ;;  %s224_s8 = sadd.s32 5, %s600_s5 }
  0x25   : > { %s361_s9 = sshll.u32 %s178_s7, 3  ;;  %s217_s7 = sadd.s32 4, %s600_s5 }
  0x26   : > { %s608_s13 = scalar_lea.vmem %s721_s1, %s361_s9  ;;  %s191_s25 = scalar_lea.vmem %s715_s2, %s189_s6 }
  0x27   : > { %v190_v0 = vld [vmem:[%s608_s13] sm:$0x1]  ;;  %v198_v3 = vld [vmem:[%s608_s13 + $0x1] sm:$0x1]  ;;  %s218_s9 = sld [smem:[#allocation3 + %s217_s7]]  ;;  %s231_s11 = sadd.s32 6, %s600_s5 }
  0x28   : > { %v192_v1 = vld [vmem:[%s191_s25] sm:$0x1]  ;;  %s199_s14 = scalar_lea.vmem %s715_s2, %s197_s10  ;;  %s225_s1 = sld [smem:[#allocation3 + %s224_s8]]  ;;  %v205_v5 = vld [vmem:[%s608_s13 + $0x2] sm:$0x1] }
  0x29   : > { %v193_v2 = vadd.f32 %v192_v1, %v190_v0  ;;  %s623_s22 = scalar_lea.vmem [#allocation4], %s360_s4  ;;  %v200_v4 = vld [vmem:[%s199_s14] sm:$0x1]  ;;  %s232_s6 = sld [smem:[#allocation3 + %s231_s11]]  ;;  %v212_v7 = vld [vmem:[%s608_s13 + $0x3] sm:$0x1] }
  0x2a   : > { %s238_s16 = sadd.s32 7, %s600_s5  ;;  %v201_v6 = vadd.f32 %v200_v4, %v198_v3  ;;  %s206_s30 = scalar_lea.vmem %s715_s2, %s204_s15  ;;  %v219_v11 = vld [vmem:[%s608_s13 + $0x4] sm:$0x1]  ;;  %v226_v13 = vld [vmem:[%s608_s13 + $0x5] sm:$0x1] }
  0x2b   : > { %195 = vst.msk [vmem:[%s623_s22] sm:$0x1] %vm194_vm0, %v193_v2  ;;  %s239_s4 = sld [smem:[#allocation3 + %s238_s16]]  ;;  %v207_v8 = vld [vmem:[%s206_s30] sm:$0x1]  ;;  %s213_s8 = scalar_lea.vmem %s715_s2, %s211_s27 }
  0x2c   : > { %202 = vst.msk [vmem:[%s623_s22 + $0x1] sm:$0x1] %vm194_vm0, %v201_v6  ;;  %v208_v9 = vadd.f32 %v207_v8, %v205_v5  ;;  %v214_v10 = vld [vmem:[%s213_s8] sm:$0x1]  ;;  %v233_v15 = vld [vmem:[%s608_s13 + $0x6] sm:$0x1] }
  0x2d   : > { %v215_v12 = vadd.f32 %v214_v10, %v212_v7  ;;  %s220_s15 = scalar_lea.vmem %s715_s2, %s218_s9  ;;  %s364_s16 = sshll.u32 %s505_s19, 7  ;;  %v240_v18 = vld [vmem:[%s608_s13 + $0x7] sm:$0x1] }
  0x2e   : > { %209 = vst.msk [vmem:[%s623_s22 + $0x2] sm:$0x1] %vm194_vm0, %v208_v9  ;;  %v221_v14 = vld [vmem:[%s220_s15] sm:$0x1]  ;;  %s227_s27 = scalar_lea.vmem %s715_s2, %s225_s1  ;;  %s260_s30 = sshll.u32 %s623_s22, 4  ;;  %s261_s30 = int_to_ptr.vmem [resolvable:$true] %s260_s30 }
  0x2f   : > { %216 = vst.msk [vmem:[%s623_s22 + $0x3] sm:$0x1] %vm194_vm0, %v215_v12  ;;  %v222_v16 = vadd.f32 %v221_v14, %v219_v11  ;;  %v228_v17 = vld [vmem:[%s227_s27] sm:$0x1]  ;;  %s234_s25 = scalar_lea.vmem %s715_s2, %s232_s6  ;;  %s667_s6 = scalar_lea.hbm %s716_s3, %s364_s16 }
  0x30   : > { %v229_v19 = vadd.f32 %v228_v17, %v226_v13  ;;  %v235_v20 = vld [vmem:[%s234_s25] sm:$0x1]  ;;  %s722_s13 = sand.u32 1, %s497_s18   ;;  %s516_s11 = smov [#allocation4]  }
  0x31   : > { %s241_s19 = scalar_lea.vmem %s715_s2, %s239_s4  ;;  %223 = vst.msk [vmem:[%s623_s22 + $0x4] sm:$0x1] %vm194_vm0, %v222_v16  ;;  %v236_v21 = vadd.f32 %v235_v20, %v233_v15  ;;  %s246_s5 = scalar_lea.sflag [#allocation5], %s722_s13 }
  0x32   : > { %v242_v22 = vld [vmem:[%s241_s19] sm:$0x1]  ;;  %230 = vst.msk [vmem:[%s623_s22 + $0x5] sm:$0x1] %vm194_vm0, %v229_v19  ;;  %s435_s4 = scalar_lea.vmem %s261_s30, 128  ;;  %s439_s15 = sshll.u32 %s516_s11, 4  ;;  %s440_s15 = int_to_ptr.vmem [resolvable:$false] %s439_s15 }
  0x33   : > { %v243_v23 = vadd.f32 %v242_v22, %v240_v18  ;;  %237 = vst.msk [vmem:[%s623_s22 + $0x6] sm:$0x1] %vm194_vm0, %v236_v21  ;;  %p436_p3 = scmp.ne.s32.totalorder %s261_s30, %s435_s4  ;;  %s441_s12 = scalar_lea.vmem %s440_s15, 256 }
  0x34   : > { %p442_p6 = scmp.lt.s32.totalorder %s261_s30, %s440_s15  ;;  %p443_p7 = scmp.lt.s32.totalorder %s441_s12, %s435_s4 }
  0x35   : > { %244 = vst.msk [vmem:[%s623_s22 + $0x7] sm:$0x1] %vm194_vm0, %v243_v23  ;;  %p437_p4 = pnand %p436_p3, %p580_p9 }
  0x36   : > { %p444_p8 = por %p443_p7, %p442_p6 }
  0x37   : > { %p438_p5 = pneg %p437_p4 }
  0x39   : > { %p445_p10 = pnand %p444_p8, %p438_p5 }
  0x3b   : > { %448 = shalt.err (!%p445_p10)
}
  0x3c   : > { %s449_s22 = scalar_lea.hbm %s667_s6, 128  ;;  %s453_s16 = scalar_lea.hbm %s716_s3, 256 }
  0x3d   : > { %p450_p11 = scmp.ne.s32.totalorder %s667_s6, %s449_s22  ;;  %p454_p1 = scmp.lt.s32.totalorder %s667_s6, %s716_s3 }
  0x3e   : > { %p455_p2 = scmp.lt.s32.totalorder %s453_s16, %s449_s22 }
  0x3f   : > { %p451_p12 = pnand %p450_p11, %p580_p9 }
  0x40   : > { %p456_p3 = por %p455_p2, %p454_p1 }
  0x41   : > { %p452_p0 = pneg %p451_p12 }
  0x43   : > { %p457_p4 = pnand %p456_p3, %p452_p0 }
  0x45   : > { %460 = shalt.err (!%p457_p4)
}
  0x46   : > { %367 = dma.vmem_to_hbm [thread:$0]  (%p580_p9), %s261_s30, 128, %s667_s6, %s246_s5  }
  0x47 PF: > { %p373_p5 = scmp.ge.s32.totalorder %s513_s21, 2  ;;  %s272_s25 = sand.u32 1, %s493_s17  }
  0x48   : > { %s273_s10 = scalar_lea.sflag [#allocation5], %s272_s25 }
  0x49   : > { %p370_p6 = pnand %p373_p5, %p587_p13 }
  0x4b   : > { %p371_p7 = pneg %p370_p6 }
  0x4d   : > { %488 = dma.done.wait (%p371_p7), %s273_s10, 128  }
  0x4e   : > { %490 = vsyncadd (%p371_p7), %s273_s10, 4294967168  ;;  %s22_s21 = sadd.s32 1, %s513_s21   ;;  %s723_s17 = smov %s497_s18 }
  0x4f   : > { %p19_p8 = scmp.ge.s32.totalorder %s22_s21, 4   ;;  %s724_s18 = smov %s501_s0 }
  0x50   : > { %s725_s0 = smov %s593_s29  ;;  %s726_s19 = smov %s509_s20 }
  0x51   : > { %s727_s20 = smov %s729_s24  ;;  %21 = sbr.rel (!%p19_p8) target bundleno = 19 (0x13), region = 74 }
  0x56   :  { %278 = vsyncpa [#allocation5], 1 }
  0x57   :  { %280 = vsyncpa [#allocation5 + $0x1], 1 }

</bundles_post_ra>
